<compile_context>
chip_gen: v6e
topology: v6e:2x2x1
jax: 0.10.0
libtpu: 0.0.40
codegen_flags: <defaults>
</compile_context>

<pallas_src>
import jax
import jax.numpy as jnp
import numpy as np
from jax import lax
from jax.experimental import pallas as pl
from jax.experimental.pallas import tpu as pltpu

N, CIN, H, W = 2, 4, 16, 16
NUM_CLASSES = 8
HW = H * W


def seg_agg_kernel(x_ref, w_ref, b_ref, o_ref):
    """Single invocation processes the whole batch.

    x_ref : (N*CIN, HW)       activations; (8, 256) == two full (8,128) vregs
    w_ref : (N*C, N*CIN)      block-diagonal 1x1-conv weight
    b_ref : (N*C, 1)          bias, tiled per batch element
    o_ref : (N, C)            aggregated per-class output (one full-block store)
    """
    n, num_classes = o_ref.shape
    hw = x_ref.shape[-1]

    x = x_ref[...]                        # (N*CIN, HW)
    wb = w_ref[...]                       # (N*C, N*CIN)
    bb = b_ref[...]                       # (N*C, 1)

    # 1x1 conv == channel matmul.  Block-diagonal weight -> one matmul yields both
    # batch elements' logits stacked along sublanes.  MXU is near-empty here (K=8):
    # accepted — pure latency, negligible vs fixed overhead at these shapes.
    logits = jnp.dot(wb, x, preferred_element_type=jnp.float32) + bb   # (N*C, HW)

    # View as (N, C, HW): sublane split in aligned groups of C=8 rows (tile-aligned).
    l3 = logits.reshape(n, num_classes, hw)

    # Per-pixel argmax over the class axis, first-occurrence tie-break (torch.argmax).
    class_iota = lax.broadcasted_iota(jnp.int32, l3.shape, 1)           # (N, C, HW)
    m = jnp.max(l3, axis=1, keepdims=True)                              # (N, 1, HW)
    idx = jnp.min(jnp.where(l3 == m, class_iota, num_classes),
                  axis=1, keepdims=True)                                # (N, 1, HW)

    # Masked spatial sum via predicated select (no explicit one-hot, no int->f32
    # cast, no extra multiply): per class, sum logits where it is the argmax.
    masked = jnp.where(class_iota == idx, l3, 0.0)                      # (N, C, HW)
    o_ref[...] = jnp.sum(masked, axis=2)                                # (N, C)


def agg_segmentation_forward(x_nchw, w, bias):
    """x_nchw: (N, CIN, H, W) f32; w: (C, CIN); bias: (C,) -> (N, C) f32."""
    n, cin, h, w_sp = x_nchw.shape
    hw = h * w_sp
    num_classes = w.shape[0]

    # (N, Cin, H, W) -> (N*Cin, H*W): contiguous reshape, fills (8,128) vregs exactly.
    x_flat = x_nchw.reshape(n * cin, hw)

    # One-time parameter prep: block-diagonal weight so rows [b*C, (b+1)*C) of the
    # single matmul output are batch b's class logits; bias tiled to match.
    w_blk = jnp.zeros((n * num_classes, n * cin), dtype=w.dtype)
    for b in range(n):
        w_blk = w_blk.at[b * num_classes:(b + 1) * num_classes,
                         b * cin:(b + 1) * cin].set(w)
    b_blk = jnp.tile(bias.reshape(num_classes, 1), (n, 1))

    # Single grid step; full arrays as single VMEM blocks; one unmasked output store.
    # (For larger batch / spatial sizes: per-batch output blocks + "parallel" batch
    #  axis to engage both v7x TensorCores, and tile HW for v7x's 64 MiB VMEM.)
    return pl.pallas_call(
        seg_agg_kernel,
        out_shape=jax.ShapeDtypeStruct((n, num_classes), jnp.float32),
        grid=(1,),
        in_specs=[
            pl.BlockSpec((n * cin, hw), lambda i: (0, 0)),
            pl.BlockSpec((n * num_classes, n * cin), lambda i: (0, 0)),
            pl.BlockSpec((n * num_classes, 1), lambda i: (0, 0)),
        ],
        out_specs=pl.BlockSpec((n, num_classes), lambda i: (0, 0)),
        compiler_params=pltpu.CompilerParams(
            dimension_semantics=("arbitrary",)),
    )(x_flat, w_blk, b_blk)


def reference(x_nchw, w, bias):
    """Plain-JAX reference matching the PyTorch wrapper semantics."""
    logits = jnp.einsum("oc,nchw->nohw", w, x_nchw) + bias[None, :, None, None]
    idx = jnp.argmax(logits, axis=1, keepdims=True)                      # (N,1,H,W)
    onehot = (lax.broadcasted_iota(jnp.int32, logits.shape, 1) == idx)   # scatter_ one-hot
    return jnp.sum(logits * onehot.astype(logits.dtype), axis=(2, 3))    # (N, C)


if __name__ == "__main__":
    key = jax.random.PRNGKey(0)
    kx, kw, kb = jax.random.split(key, 3)

    x = jax.random.normal(kx, (N, CIN, H, W), dtype=jnp.float32)
    # Deterministic synthetic "segmentation head" parameters (1x1 conv).
    conv_w = jax.random.normal(kw, (NUM_CLASSES, CIN), dtype=jnp.float32) * 0.1
    conv_b = jax.random.normal(kb, (NUM_CLASSES,), dtype=jnp.float32) * 0.1

    out = agg_segmentation_forward(x, conv_w, conv_b)
    out = jax.block_until_ready(out)

    ref = jax.block_until_ready(reference(x, conv_w, conv_b))
    np.testing.assert_allclose(np.asarray(out), np.asarray(ref), rtol=1e-5, atol=1e-5)

    print("KERNEL_OK")
</pallas_src>

<mosaic_0001>
module attributes {stable_mosaic.version = 11 : i64} {
  func.func @seg_agg_kernel(%arg0: i32, %arg1: memref<8x256xf32, #tpu.memory_space<vmem>>, %arg2: memref<16x8xf32, #tpu.memory_space<vmem>>, %arg3: memref<16x1xf32, #tpu.memory_space<vmem>>, %arg4: memref<2x8xf32, #tpu.memory_space<vmem>>) attributes {dimension_semantics = [#tpu.dimension_semantics<arbitrary>], iteration_bounds = array<i64: 1>, scalar_prefetch = 0 : i64, scratch_operands = 0 : i64, tpu.core_type = #tpu.core_type<tc>, window_params = [{pipeline_mode = #tpu.pipeline_mode<synchronous>, transform_indices = @transform_0, window_bounds = array<i64: 8, 256>}, {pipeline_mode = #tpu.pipeline_mode<synchronous>, transform_indices = @transform_1, window_bounds = array<i64: 16, 8>}, {pipeline_mode = #tpu.pipeline_mode<synchronous>, transform_indices = @transform_2, window_bounds = array<i64: 16, 1>}, {pipeline_mode = #tpu.pipeline_mode<synchronous>, transform_indices = @transform_3, window_bounds = array<i64: 2, 8>}]} {
    %c0 = arith.constant 0 : index
    %c0_0 = arith.constant 0 : index
    %0 = vector.load %arg1[%c0, %c0_0] : memref<8x256xf32, #tpu.memory_space<vmem>>, vector<8x256xf32>
    %c0_1 = arith.constant 0 : index
    %c0_2 = arith.constant 0 : index
    %1 = vector.load %arg2[%c0_1, %c0_2] : memref<16x8xf32, #tpu.memory_space<vmem>>, vector<16x8xf32>
    %c0_3 = arith.constant 0 : index
    %c0_4 = arith.constant 0 : index
    %2 = vector.load %arg3[%c0_3, %c0_4] : memref<16x1xf32, #tpu.memory_space<vmem>>, vector<16x1xf32>
    %cst = arith.constant dense<0.000000e+00> : vector<16x256xf32>
    %3 = tpu.matmul %1, %0, %cst {dimension_numbers = #tpu.dot_dimension_numbers<[1], [0], [0], [1], [0, 0, 1, 1], [], []>} : vector<16x8xf32>, vector<8x256xf32>, vector<16x256xf32> -> vector<16x256xf32>
    %4 = vector.broadcast %2 : vector<16x1xf32> to vector<16x256xf32>
    %5 = arith.addf %3, %4 : vector<16x256xf32>
    %6 = vector.shape_cast %5 : vector<16x256xf32> to vector<2x8x256xf32>
    %7 = tpu.iota {dimensions = array<i32: 1>} : vector<2x8x256xi32>
    %cst_5 = arith.constant dense<0xFF800000> : vector<2x256xf32>
    %8 = vector.multi_reduction <maximumf>, %6, %cst_5 [1] : vector<2x8x256xf32> to vector<2x256xf32>
    %9 = vector.shape_cast %8 : vector<2x256xf32> to vector<2x1x256xf32>
    %10 = vector.broadcast %9 : vector<2x1x256xf32> to vector<2x8x256xf32>
    %11 = arith.cmpf oeq, %6, %10 : vector<2x8x256xf32>
    %c8_i32 = arith.constant 8 : i32
    %12 = vector.broadcast %c8_i32 : i32 to vector<2x8x256xi32>
    %13 = arith.select %11, %7, %12 : vector<2x8x256xi1>, vector<2x8x256xi32>
    %cst_6 = arith.constant dense<2147483647> : vector<2x256xi32>
    %14 = vector.multi_reduction <minsi>, %13, %cst_6 [1] : vector<2x8x256xi32> to vector<2x256xi32>
    %15 = vector.shape_cast %14 : vector<2x256xi32> to vector<2x1x256xi32>
    %16 = vector.broadcast %15 : vector<2x1x256xi32> to vector<2x8x256xi32>
    %17 = arith.cmpi eq, %7, %16 : vector<2x8x256xi32>
    %cst_7 = arith.constant 0.000000e+00 : f32
    %18 = vector.broadcast %cst_7 : f32 to vector<2x8x256xf32>
    %19 = arith.select %17, %6, %18 : vector<2x8x256xi1>, vector<2x8x256xf32>
    %cst_8 = arith.constant dense<0.000000e+00> : vector<2x8xf32>
    %20 = vector.multi_reduction <add>, %19, %cst_8 [2] : vector<2x8x256xf32> to vector<2x8xf32>
    %c0_9 = arith.constant 0 : index
    %c0_10 = arith.constant 0 : index
    %21 = vector.load %arg4[%c0_9, %c0_10] : memref<2x8xf32, #tpu.memory_space<vmem>>, vector<2x8xf32>
    tpu.vector_store %arg4[%c0_9, %c0_10], %20 {strides = array<i32>} : memref<2x8xf32, #tpu.memory_space<vmem>>, vector<2x8xf32>,
    return
  }
  func.func @transform_0(%arg0: i32) -> (i32, i32) {
    %c0_i32 = arith.constant 0 : i32
    %c0_i32_0 = arith.constant 0 : i32
    %c0_i32_1 = arith.constant 0 : i32
    return %c0_i32, %c0_i32_0 : i32, i32
  }
  func.func @transform_1(%arg0: i32) -> (i32, i32) {
    %c0_i32 = arith.constant 0 : i32
    %c0_i32_0 = arith.constant 0 : i32
    %c0_i32_1 = arith.constant 0 : i32
    return %c0_i32, %c0_i32_0 : i32, i32
  }
  func.func @transform_2(%arg0: i32) -> (i32, i32) {
    %c0_i32 = arith.constant 0 : i32
    %c0_i32_0 = arith.constant 0 : i32
    %c0_i32_1 = arith.constant 0 : i32
    return %c0_i32, %c0_i32_0 : i32, i32
  }
  func.func @transform_3(%arg0: i32) -> (i32, i32) {
    %c0_i32 = arith.constant 0 : i32
    %c0_i32_0 = arith.constant 0 : i32
    %c0_i32_1 = arith.constant 0 : i32
    return %c0_i32, %c0_i32_0 : i32, i32
  }
}

</mosaic_0001>

<bundles_post_ra>
// kernel: tpu_custom_call.1
= control target key start
LH: loop header
LB: loop body
LE: loop exit
PB: predicated region body
PF: predicated region fallthrough
CT: control target
= control target key end

     0   :  { %vm31_vm0 = vcmask 64512   ;;  %s341_s0 = inlined_call_operand.vmem [shape: f32[8,256], index: 0, kind: input, shape index: {}]   ;;  %s342_s1 = inlined_call_operand.vmem [shape: f32[16,8], index: 1, kind: input, shape index: {}]   ;;  %s343_s2 = inlined_call_operand.vmem [shape: f32[16,1], index: 2, kind: input, shape index: {}]   ;;  %s344_s3 = inlined_call_operand.hbm [shape: f32[2,8], index: 3, kind: output, shape index: {}]  }
   0x1   :  { %v16_v0 = vld [vmem:[%s341_s0 + $0x8] sm:$0xff]  ;;  %v15_v1 = vld [vmem:[%s341_s0] sm:$0xff] }
   0x2   :  { %68 = vmatprep.subr.mxu0 %v16_v0  ;;  %232 = vmatprep.subr.mxu1 %v16_v0  ;;  %v17_v2 = vld [vmem:[%s342_s1] sm:$0xff]  ;;  %v18_v3 = vld [vmem:[%s342_s1 + $0x8] sm:$0xff] }
   0x3   :  { %69 = vmatpush1.msra.mxu0 %v15_v1  ;;  %233 = vmatpush1.msra.mxu1 %v15_v1 }
   0x4   :  { %8 = vsyncpa [#allocation3], 0  ;;  %v260_v4 = vmov 0.0   ;;  %v19_v5 = vld [vmem:[%s343_s2] sm:$0xff]  ;;  %v261_v6 = vmov 0   ;;  %v20_v7 = vld [vmem:[%s343_s2 + $0x8] sm:$0xff]  ;;  %v115_v28 = vlaneseq }
   0x5   :  { %102 = vmatprep.mubr.f32.mxu0 %v260_v4  ;;  %108 = vmatprep.mubr.f32.mxu1 %v260_v4  ;;  %s262_s1 = smov [#allocation2]  }
   0x6   :  { %230 = vmatmul.mubr.msk.f32.vlgmr.msra.gmra.mxu0 %vm31_vm0, %v17_v2  ;;  %231 = vmatmul.mubr.msk.f32.vlgmr.msra.gmra.mxu1 %vm31_vm0, %v18_v3  ;;  %v318_v37 = vshrl.u32 %v115_v28, 7  ;;  %s222_s2 = sshll.u32 %s262_s1, 4  ;;  %s223_s2 = int_to_ptr.vmem [resolvable:$true] %s222_s2 }
   0x7   :  { %237 = vset.pattern.permute.xlu0 %v261_v6  ;;  %s238_s23 = scalar_lea.vmem %s223_s2, 32  ;;  %p243_p1 = scmp.lt.s32.totalorder %s223_s2, %s223_s2 }
   0x8   :  { %23 = vperm.xlu0 %237, %v19_v5   ;;  %p239_p0 = scmp.ne.s32.totalorder %s223_s2, %s238_s23  ;;  %p244_p2 = scmp.lt.s32.totalorder %s238_s23, %s238_s23 }
   0xa   :  { %p245_p3 = por %p244_p2, %p243_p1 }
   0xc   :  { %28 = vperm.xlu0 %237, %v20_v7   ;;  %p246_p4 = pnand %p245_p3, %p239_p0 }
  0x83   :  { %v24_v8 = vpop.permute.xlu0 %23 }
  0x87   :  { %v29_v9 = vpop.permute.xlu0 %28 }
  0xc6   :  { %v104_v10 = vpop.f32.mrf.mxu0  ;;  %v110_v11 = vpop.f32.mrf.mxu1 }
  0xc7   :  { %v301_v12 = vadd.f32 %v104_v10, %v24_v8  ;;  %v303_v13 = vadd.f32 %v110_v11, %v29_v9 }
  0xc8   :  { %v106_v14 = vpop.f32.mrf.mxu0  ;;  %v112_v15 = vpop.f32.mrf.mxu1 }
  0xc9   :  { %v117_v16 = vrot.slane %v301_v12, 4  ;;  %v129_v17 = vrot.slane %v303_v13, 4  ;;  %v307_v18 = vadd.f32 %v106_v14, %v24_v8  ;;  %v309_v19 = vadd.f32 %v112_v15, %v29_v9 }
  0xcb   :  { %v118_v20 = vmax.f32 %v301_v12, %v117_v16  ;;  %v130_v21 = vmax.f32 %v303_v13, %v129_v17  ;;  %v123_v22 = vrot.slane %v307_v18, 4  ;;  %v135_v23 = vrot.slane %v309_v19, 4 }
  0xcc   :  { %v202_v16 = vand.u32 127, %v115_v28 }
  0xcd   :  { %v119_v24 = vrot.slane %v118_v20, 2  ;;  %v131_v25 = vrot.slane %v130_v21, 2  ;;  %v124_v26 = vmax.f32 %v307_v18, %v123_v22  ;;  %v136_v27 = vmax.f32 %v309_v19, %v135_v23 }
  0xcf   :  { %v120_v29 = vmax.f32 %v118_v20, %v119_v24  ;;  %v132_v30 = vmax.f32 %v130_v21, %v131_v25  ;;  %v125_v31 = vrot.slane %v124_v26, 2  ;;  %v137_v32 = vrot.slane %v136_v27, 2 }
  0xd0   :  { %v205_v20 = vsub.s32 %v202_v16, %v318_v37 }
  0xd1   :  { %v121_v33 = vrot.slane %v120_v29, 1  ;;  %v133_v34 = vrot.slane %v132_v30, 1  ;;  %v126_v35 = vmax.f32 %v124_v26, %v125_v31  ;;  %v138_v36 = vmax.f32 %v136_v27, %v137_v32 }
  0xd3   :  { %v122_v38 = vmax.f32 %v120_v29, %v121_v33  ;;  %v134_v39 = vmax.f32 %v132_v30, %v133_v34  ;;  %v127_v40 = vrot.slane %v126_v35, 1  ;;  %v139_v41 = vrot.slane %v138_v36, 1 }
  0xd5   :  { %vm141_vm1 = vcmp.eq.f32.partialorder %v301_v12, %v122_v38  ;;  %vm143_vm2 = vcmp.eq.f32.partialorder %v303_v13, %v134_v39  ;;  %v128_v42 = vmax.f32 %v126_v35, %v127_v40  ;;  %v140_v43 = vmax.f32 %v138_v36, %v139_v41 }
  0xd6   :  { %v145_v44 = vsel %vm141_vm1, %v318_v37, 8  ;;  %v147_v45 = vsel %vm143_vm2, %v318_v37, 8 }
  0xd7   :  { %v167_v46 = vrot.slane %v147_v45, 4  ;;  %vm142_vm3 = vcmp.eq.f32.partialorder %v307_v18, %v128_v42  ;;  %vm144_vm4 = vcmp.eq.f32.partialorder %v309_v19, %v140_v43  ;;  %v149_v47 = vrot.slane %v145_v44, 4 }
  0xd8   :  { %v146_v48 = vsel %vm142_vm3, %v318_v37, 8  ;;  %v148_v49 = vsel %vm144_vm4, %v318_v37, 8 }
  0xd9   :  { %v176_v50 = vrot.slane %v148_v49, 4  ;;  %vm150_vm5 = vcmp.lt.s32.totalorder %v145_v44, %v149_v47  ;;  %v158_v51 = vrot.slane %v146_v48, 4  ;;  %vm168_vm6 = vcmp.lt.s32.totalorder %v147_v45, %v167_v46 }
  0xda   :  { %v151_v52 = vsel %vm150_vm5, %v145_v44, %v149_v47  ;;  %v169_v53 = vsel %vm168_vm6, %v147_v45, %v167_v46  ;;  %vm211_vm5 = vcmask 1041409   ;;  %vm214_vm6 = vcmask 58368  }
  0xdb   :  { %v152_v54 = vrot.slane %v151_v52, 2  ;;  %vm159_vm7 = vcmp.lt.s32.totalorder %v146_v48, %v158_v51  ;;  %v170_v55 = vrot.slane %v169_v53, 2  ;;  %vm177_vm8 = vcmp.lt.s32.totalorder %v148_v49, %v176_v50 }
  0xdc   :  { %v160_v56 = vsel %vm159_vm7, %v146_v48, %v158_v51  ;;  %v178_v57 = vsel %vm177_vm8, %v148_v49, %v176_v50 }
  0xdd   :  { %vm153_vm9 = vcmp.lt.s32.totalorder %v151_v52, %v152_v54  ;;  %v161_v58 = vrot.slane %v160_v56, 2  ;;  %vm171_vm10 = vcmp.lt.s32.totalorder %v169_v53, %v170_v55  ;;  %v179_v59 = vrot.slane %v178_v57, 2 }
  0xde   :  { %v154_v60 = vsel %vm153_vm9, %v151_v52, %v152_v54  ;;  %v172_v61 = vsel %vm171_vm10, %v169_v53, %v170_v55 }
  0xdf   :  { %v155_v62 = vrot.slane %v154_v60, 1  ;;  %vm162_vm11 = vcmp.lt.s32.totalorder %v160_v56, %v161_v58  ;;  %v173_v63 = vrot.slane %v172_v61, 1  ;;  %vm180_vm12 = vcmp.lt.s32.totalorder %v178_v57, %v179_v59 }
  0xe0   :  { %v163_v0 = vsel %vm162_vm11, %v160_v56, %v161_v58  ;;  %v181_v1 = vsel %vm180_vm12, %v178_v57, %v179_v59 }
  0xe1   :  { %vm156_vm13 = vcmp.lt.s32.totalorder %v154_v60, %v155_v62  ;;  %v164_v2 = vrot.slane %v163_v0, 1  ;;  %vm174_vm14 = vcmp.lt.s32.totalorder %v172_v61, %v173_v63  ;;  %v182_v3 = vrot.slane %v181_v1, 1 }
  0xe2   :  { %v157_v4 = vsel %vm156_vm13, %v154_v60, %v155_v62  ;;  %v175_v6 = vsel %vm174_vm14, %v172_v61, %v173_v63 }
  0xe3   :  { %vm165_vm15 = vcmp.lt.s32.totalorder %v163_v0, %v164_v2  ;;  %vm185_vm0 = vcmp.eq.s32.totalorder %v318_v37, %v157_v4  ;;  %vm183_vm1 = vcmp.lt.s32.totalorder %v181_v1, %v182_v3  ;;  %vm187_vm4 = vcmp.eq.s32.totalorder %v318_v37, %v175_v6 }
  0xe4   :  { %v166_v5 = vsel %vm165_vm15, %v163_v0, %v164_v2  ;;  %v184_v7 = vsel %vm183_vm1, %v181_v1, %v182_v3  ;;  %v189_v8 = vsel %vm185_vm0, %v301_v12, 0.0  ;;  %v191_v14 = vsel %vm187_vm4, %v303_v13, 0.0 }
  0xe5   :  { %vm186_vm2 = vcmp.eq.s32.totalorder %v318_v37, %v166_v5  ;;  %vm188_vm3 = vcmp.eq.s32.totalorder %v318_v37, %v184_v7 }
  0xe6   :  { %v190_v9 = vsel %vm186_vm2, %v307_v18, 0.0  ;;  %v192_v11 = vsel %vm188_vm3, %v309_v19, 0.0 }
  0xe7   :  { %v193_v10 = vadd.f32 %v190_v9, %v189_v8  ;;  %v196_v15 = vadd.f32 %v192_v11, %v191_v14 }
  0xe9   :  { %194 = vadd.xlane.f32.xlu1 %v193_v10 }
  0xed   :  { %197 = vadd.xlane.f32.xlu1 %v196_v15 }
 0x172   :  { %v195_v17 = vpop.xlane.xlu1 %194 }
 0x173   :  { %v206_v18 = vrot.slane %v195_v17, %v205_v20 }
 0x176   :  { %v198_v12 = vpop.xlane.xlu1 %197 }
 0x177   :  { %v210_v21 = vrot.slane %v198_v12, %v205_v20 }
 0x179   :  { %v212_v22 = vsel %vm211_vm5, %v210_v21, %v206_v18 }
 0x17a   :  { %215 = vst.msk [vmem:[#allocation2] sm:$0x3] %vm214_vm6, %v212_v22 }
 0x17b   :  { %249 = shalt.err (!%p246_p4)
}
 0x17c   :  { %225 = dma.vmem_to_hbm [thread:$0]  %s223_s2, 32, %s344_s3, [#allocation3]  }
 0x17d   :  { %258 = dma.done.wait [#allocation3], 32  }
 0x17e   :  { %259 = vsyncadd [#allocation3], 4294967264 }
 0x17f   :  { %229 = vsyncpa [#allocation3], 1 }

</bundles_post_ra>
